<compile_context>
chip_gen: v7x
topology: tpu7x:2x2x1
jax: 0.10.0
libtpu: 0.0.40
codegen_flags: <defaults>
</compile_context>

<pallas_src>
import jax
import jax.numpy as jnp
import numpy as np
from jax import lax
from jax.experimental import pallas as pl
from jax.experimental.pallas import tpu as pltpu


def _round_up(x, m):
    return ((x + m - 1) // m) * m


def _indiv_kernel(idx_ref, emb_ref, params_ref, noise_ref, out_ref):
    """One node tile: out = emb[idx] + mean + exp(log_std) * noise, single dense store."""
    tile_m = out_ref.shape[0]
    max_nodes = emb_ref.shape[0]

    # Vectorized row gather via one-hot matmul on the MXU. precision=HIGHEST keeps the
    # f32 table bit-exact (one-hot rows of 0.0/1.0 are exactly representable).
    idx = idx_ref[...]                                                   # (tile_m, 1) i32
    onehot = lax.broadcasted_iota(jnp.int32, (tile_m, max_nodes), 1) == idx
    gathered = jnp.dot(onehot.astype(jnp.float32), emb_ref[...],
                       preferred_element_type=jnp.float32,
                       precision=lax.Precision.HIGHEST)                  # (tile_m, D)

    mean = params_ref[0:1, :]                                            # (1, D)
    std = params_ref[1:2, :]                                             # (1, D) = exp(log_std)
    out_ref[...] = gathered + mean + std * noise_ref[...]


def node_individualizer_fwd(ordering, pos_embed, rand_mean, rand_log_std,
                            noise=None, seed=0, tile_m=512):
    """Pallas implementation of NodeIndividualizer.forward ({'ordering','random'}).

    ordering:      (num_nodes,) int32 node ordering indices (graphs.ordering)
    pos_embed:     (max_nodes, embed_dim) float32 embedding table
    rand_mean:     (embed_dim,) float32
    rand_log_std:  (embed_dim,) float32
    noise:         optional (num_nodes, embed_dim) float32 randn draw; if None it is
                   drawn in the wrapper from PRNGKey(seed).
    returns:       (num_nodes, embed_dim) float32
    """
    num_nodes = int(ordering.shape[0])
    max_nodes, embed_dim = pos_embed.shape

    if noise is None:
        # TODO(synk): on-chip Gaussian RNG (pltpu.prng_seed / stateful_normal) only
        # lowers on a real TPU backend; draw once here instead.
        noise = jax.random.normal(jax.random.PRNGKey(int(seed)),
                                  (num_nodes, embed_dim), dtype=jnp.float32)

    emb = pos_embed.astype(jnp.float32)
    params = jnp.stack([rand_mean.astype(jnp.float32),
                        jnp.exp(rand_log_std.astype(jnp.float32))], axis=0)  # (2, D)
    noise = noise.astype(jnp.float32)

    # Lane-dense output: pad embed_dim up to a multiple of 128 if needed (no-op at 128).
    d_pad = _round_up(embed_dim, 128)
    if d_pad != embed_dim:
        pc = d_pad - embed_dim
        emb = jnp.pad(emb, ((0, 0), (0, pc)))
        params = jnp.pad(params, ((0, 0), (0, pc)))
        noise = jnp.pad(noise, ((0, 0), (0, pc)))

    # Node-tile size: large enough to amortize ~0.35us per grid step, but capped so
    # there are >= 2 tiles when possible (both v7x TensorCores get work). Multiple of 8.
    half = _round_up(max((num_nodes + 1) // 2, 1), 8)
    tile_m = max(8, min(int(tile_m), half))
    grid = (pl.cdiv(num_nodes, tile_m),)

    idx2 = ordering.astype(jnp.int32).reshape(num_nodes, 1)

    # Note: for very large tables on v7x (64 MiB VMEM), cap VMEM via
    # pltpu.CompilerParams(vmem_limit_bytes=...) and/or tile embed_dim; the resident
    # table here is tiny so the default scoped limit is ample.
    out = pl.pallas_call(
        _indiv_kernel,
        out_shape=jax.ShapeDtypeStruct((num_nodes, d_pad), jnp.float32),
        grid=grid,
        in_specs=[
            pl.BlockSpec((tile_m, 1), lambda i: (i, 0)),           # ordering tile
            pl.BlockSpec((max_nodes, d_pad), lambda i: (0, 0)),    # full table, resident
            pl.BlockSpec((2, d_pad), lambda i: (0, 0)),            # [mean; exp(log_std)]
            pl.BlockSpec((tile_m, d_pad), lambda i: (i, 0)),       # noise tile
        ],
        out_specs=pl.BlockSpec((tile_m, d_pad), lambda i: (i, 0)),
        compiler_params=pltpu.CompilerParams(dimension_semantics=("parallel",)),
    )(idx2, emb, params, noise)

    return out if d_pad == embed_dim else out[:, :embed_dim]


if __name__ == "__main__":
    # Small, module-consistent shapes.
    num_nodes = 16     # graphs.num_nodes
    max_nodes = 32
    embed_dim = 128

    key = jax.random.PRNGKey(0)
    k_emb, k_ord, k_noise, k_ord2, k_noise2, k_mean, k_lstd = jax.random.split(key, 7)

    # Parameters (per __init__): Embedding weight ~ N(0,1); rand_mean / rand_log_std = zeros.
    pos_embed = jax.random.normal(k_emb, (max_nodes, embed_dim), dtype=jnp.float32)
    rand_mean = jnp.zeros((embed_dim,), dtype=jnp.float32)
    rand_log_std = jnp.zeros((embed_dim,), dtype=jnp.float32)

    ordering = jax.random.randint(k_ord, (num_nodes,), 0, max_nodes, dtype=jnp.int32)
    noise = jax.random.normal(k_noise, (num_nodes, embed_dim), dtype=jnp.float32)

    # 1) External-noise path: exact check against a pure-JAX reference of the torch forward.
    out = node_individualizer_fwd(ordering, pos_embed, rand_mean, rand_log_std, noise=noise)
    out = jax.block_until_ready(out)
    ref = pos_embed[ordering] + rand_mean + jnp.exp(rand_log_std) * noise
    np.testing.assert_allclose(np.asarray(out), np.asarray(ref), rtol=1e-6, atol=1e-6)

    # 2) Multi-tile + ragged boundary case (num_nodes not a multiple of the tile),
    #    with non-trivial mean / log_std.
    n2 = 40
    mean2 = 0.1 * jax.random.normal(k_mean, (embed_dim,), dtype=jnp.float32)
    lstd2 = 0.1 * jax.random.normal(k_lstd, (embed_dim,), dtype=jnp.float32)
    ordering2 = jax.random.randint(k_ord2, (n2,), 0, max_nodes, dtype=jnp.int32)
    noise2 = jax.random.normal(k_noise2, (n2, embed_dim), dtype=jnp.float32)
    out2 = node_individualizer_fwd(ordering2, pos_embed, mean2, lstd2,
                                   noise=noise2, tile_m=16)
    out2 = jax.block_until_ready(out2)
    ref2 = pos_embed[ordering2] + mean2 + jnp.exp(lstd2) * noise2
    np.testing.assert_allclose(np.asarray(out2), np.asarray(ref2), rtol=1e-6, atol=1e-6)

    # 3) Wrapper-drawn noise path (noise=None): deterministic given the seed and exact
    #    against the same draw.
    out_a = node_individualizer_fwd(ordering, pos_embed, rand_mean, rand_log_std, seed=123)
    out_b = node_individualizer_fwd(ordering, pos_embed, rand_mean, rand_log_std, seed=123)
    out_a, out_b = jax.block_until_ready((out_a, out_b))
    np.testing.assert_allclose(np.asarray(out_a), np.asarray(out_b), rtol=0, atol=0)
    noise3 = jax.random.normal(jax.random.PRNGKey(123), (num_nodes, embed_dim),
                               dtype=jnp.float32)
    ref3 = pos_embed[ordering] + rand_mean + jnp.exp(rand_log_std) * noise3
    np.testing.assert_allclose(np.asarray(out_a), np.asarray(ref3), rtol=1e-6, atol=1e-6)

    print("KERNEL_OK")
</pallas_src>

<mosaic_0001>
module attributes {stable_mosaic.version = 11 : i64} {
  func.func @_indiv_kernel(%arg0: i32, %arg1: memref<8x1xi32, #tpu.memory_space<vmem>>, %arg2: memref<32x128xf32, #tpu.memory_space<vmem>>, %arg3: memref<2x128xf32, #tpu.memory_space<vmem>>, %arg4: memref<8x128xf32, #tpu.memory_space<vmem>>, %arg5: memref<8x128xf32, #tpu.memory_space<vmem>>) attributes {dimension_semantics = [#tpu.dimension_semantics<parallel>], iteration_bounds = array<i64: 2>, scalar_prefetch = 0 : i64, scratch_operands = 0 : i64, tpu.core_type = #tpu.core_type<tc>, window_params = [{transform_indices = @transform_0, window_bounds = array<i64: 8, 1>}, {pipeline_mode = #tpu.pipeline_mode<synchronous>, transform_indices = @transform_1, window_bounds = array<i64: 32, 128>}, {pipeline_mode = #tpu.pipeline_mode<synchronous>, transform_indices = @transform_2, window_bounds = array<i64: 2, 128>}, {transform_indices = @transform_3, window_bounds = array<i64: 8, 128>}, {transform_indices = @transform_4, window_bounds = array<i64: 8, 128>}]} {
    %c0 = arith.constant 0 : index
    %c0_0 = arith.constant 0 : index
    %0 = vector.load %arg1[%c0, %c0_0] : memref<8x1xi32, #tpu.memory_space<vmem>>, vector<8x1xi32>
    %1 = tpu.iota {dimensions = array<i32: 1>} : vector<8x32xi32>
    %2 = vector.broadcast %0 : vector<8x1xi32> to vector<8x32xi32>
    %3 = arith.cmpi eq, %1, %2 : vector<8x32xi32>
    %4 = arith.extui %3 : vector<8x32xi1> to vector<8x32xi32>
    %5 = arith.sitofp %4 : vector<8x32xi32> to vector<8x32xf32>
    %c0_1 = arith.constant 0 : index
    %c0_2 = arith.constant 0 : index
    %6 = vector.load %arg2[%c0_1, %c0_2] : memref<32x128xf32, #tpu.memory_space<vmem>>, vector<32x128xf32>
    %cst = arith.constant dense<0.000000e+00> : vector<8x128xf32>
    %7 = tpu.matmul %5, %6, %cst {dimension_numbers = #tpu.dot_dimension_numbers<[1], [0], [0], [1], [0, 0, 1, 1], [], []>, precision = #tpu.contract_precision<fp32>} : vector<8x32xf32>, vector<32x128xf32>, vector<8x128xf32> -> vector<8x128xf32>
    %c0_3 = arith.constant 0 : index
    %c0_4 = arith.constant 0 : index
    %8 = vector.load %arg3[%c0_3, %c0_4] : memref<2x128xf32, #tpu.memory_space<vmem>>, vector<1x128xf32>
    %c1 = arith.constant 1 : index
    %c0_5 = arith.constant 0 : index
    %9 = vector.load %arg3[%c1, %c0_5] : memref<2x128xf32, #tpu.memory_space<vmem>>, vector<1x128xf32>
    %10 = vector.broadcast %8 : vector<1x128xf32> to vector<8x128xf32>
    %11 = arith.addf %7, %10 : vector<8x128xf32>
    %c0_6 = arith.constant 0 : index
    %c0_7 = arith.constant 0 : index
    %12 = vector.load %arg4[%c0_6, %c0_7] : memref<8x128xf32, #tpu.memory_space<vmem>>, vector<8x128xf32>
    %13 = vector.broadcast %9 : vector<1x128xf32> to vector<8x128xf32>
    %14 = arith.mulf %13, %12 : vector<8x128xf32>
    %15 = arith.addf %11, %14 : vector<8x128xf32>
    %c0_8 = arith.constant 0 : index
    %c0_9 = arith.constant 0 : index
    %16 = vector.load %arg5[%c0_8, %c0_9] : memref<8x128xf32, #tpu.memory_space<vmem>>, vector<8x128xf32>
    tpu.vector_store %arg5[%c0_8, %c0_9], %15 {strides = array<i32>} : memref<8x128xf32, #tpu.memory_space<vmem>>, vector<8x128xf32>,
    return
  }
  func.func @transform_0(%arg0: i32) -> (i32, i32) {
    %c0_i32 = arith.constant 0 : i32
    %c0_i32_0 = arith.constant 0 : i32
    return %arg0, %c0_i32 : i32, i32
  }
  func.func @transform_1(%arg0: i32) -> (i32, i32) {
    %c0_i32 = arith.constant 0 : i32
    %c0_i32_0 = arith.constant 0 : i32
    %c0_i32_1 = arith.constant 0 : i32
    return %c0_i32, %c0_i32_0 : i32, i32
  }
  func.func @transform_2(%arg0: i32) -> (i32, i32) {
    %c0_i32 = arith.constant 0 : i32
    %c0_i32_0 = arith.constant 0 : i32
    %c0_i32_1 = arith.constant 0 : i32
    return %c0_i32, %c0_i32_0 : i32, i32
  }
  func.func @transform_3(%arg0: i32) -> (i32, i32) {
    %c0_i32 = arith.constant 0 : i32
    %c0_i32_0 = arith.constant 0 : i32
    return %arg0, %c0_i32 : i32, i32
  }
  func.func @transform_4(%arg0: i32) -> (i32, i32) {
    %c0_i32 = arith.constant 0 : i32
    %c0_i32_0 = arith.constant 0 : i32
    return %arg0, %c0_i32 : i32, i32
  }
}

</mosaic_0001>

<bundles_post_ra>
// kernel: tpu_custom_call.1
= control target key start
LH: loop header
LB: loop body
LE: loop exit
PB: predicated region body
PF: predicated region fallthrough
CT: control target
= control target key end

     0   :  { %9 = vsyncpa [#allocation3], 0  ;;  %s1355_s0 = inlined_call_operand.vmem [shape: s32[16,1], index: 0, kind: input, shape index: {}]   ;;  %s1356_s1 = inlined_call_operand.hbm [shape: f32[32,128], index: 1, kind: input, shape index: {}]   ;;  %s1357_s2 = inlined_call_operand.vmem [shape: f32[2,128], index: 2, kind: input, shape index: {}]   ;;  %s1358_s3 = inlined_call_operand.vmem [shape: f32[16,128], index: 3, kind: input, shape index: {}]   ;;  %s1359_s4 = inlined_call_operand.hbm [shape: f32[16,128], index: 4, kind: output, shape index: {}]  }
   0x1   :  { %10 = vsyncpa [#allocation4], 0 }
   0x2   :  { %12 = vsyncpa [#allocation4 + $0x1], 0  ;;  %s1175_s15 = smov 0   ;;  %s1177_s16 = smov 0  }
   0x3   :  { %s1179_s17 = smov 0   ;;  %s1181_s18 = smov 0  }
   0x4 LB: > { %s1196_s19 = sadd.s32 4294967295, %s1140_s18   ;;  %s838_s20 = sadd.s32 4294967294, %s1140_s18   ;;  %s1140_s18 = sphi %s1181_s18, %s1375_s18   ;;  %s1136_s17 = sphi %s1179_s17, %s1374_s17   ;;  %s1132_s16 = sphi %s1177_s16, %s1373_s16   ;;  %s1128_s15 = sphi %s1175_s15, %s1372_s15  }
   0x5   : > { %s1200_s21 = sadd.s32 1, %s1140_s18   ;;  %s119_s22 = sadd.s32 1, %s1136_s17 }
   0x6   : > { %s116_s23 = ssub.s32 %s1140_s18, %s1200_s21  ;;  %p129_p0 = scmp.ne.s32.totalorder %s1136_s17, %s1132_s16 }
   0x7   : > { %p117_p1 = scmp.eq.s32.totalorder %s116_s23, 0  ;;  %p130_p2 = scmp.eq.s32.totalorder %s1196_s19, 1 }
   0x8   : > { %p135_p3 = scmp.ne.s32.totalorder %s1132_s16, %s1128_s15  ;;  %p136_p4 = scmp.eq.s32.totalorder %s838_s20, 1 }
   0x9   : > { %s1211_s24 = scalar_select %p117_p1, %s1136_s17, %s119_s22  }
   0xa   : > { %p1213_p5 = por %p130_p2, %p129_p0  ;;  %p1217_p6 = por %p136_p4, %p135_p3 }
   0xb   : > { %p839_p7 = scmp.ge.s32.totalorder %s1140_s18, 1  ;;  %p143_p8 = scmp.lt.s32.totalorder %s1140_s18, 3 }
   0xc   : > { %s1363_s25 = scalar_select %p1213_p5, 1, 0 }
   0xd   : > { %s1364_s26 = scalar_select %p1217_p6, 1, 0 }
   0xe   : > { %p1360_p9 = scmp.eq.s32.totalorder %s1196_s19, 0  ;;  %p1224_p10 = pnand %p839_p7, %p143_p8 }
   0xf   : > { %s1142_s28 = smov [#allocation2]   ;;  %s1046_s7 = scalar_lea.hbm %s1356_s1, 512 }
  0x10   : > { %s1365_s27 = scalar_select %p1224_p10, 1, 0 }
  0x11   : > { %s155_s29 = sshll.u32 %s1142_s28, 4  ;;  %p995_p11 = pneg %p1224_p10  ;;  %s156_s29 = int_to_ptr.vmem [resolvable:$true] %s155_s29 }
  0x12   : > { %p1047_p13 = scmp.ne.s32.totalorder %s1356_s1, %s1046_s7  ;;  %p1053_p3 = scmp.lt.u32.totalorder %s1046_s7, %s1356_s1 }
  0x13   : > { %p1232_p12 = pnand %p1360_p9, %p995_p11 }
  0x15   : > { %p1048_p0 = pneg %p1232_p12 }
  0x17   : > { %p1049_p1 = pnand %p1048_p0, %p1047_p13 }
  0x19   : > { %p1050_p2 = pneg %p1049_p1 }
  0x1b   : > { %p1055_p4 = pnand %p1053_p3, %p1050_p2 }
  0x1d   : > { %1058 = shalt.err (!%p1055_p4)
}
  0x1e   : > { %s1059_s12 = scalar_lea.vmem %s156_s29, 512  ;;  %p1067_p9 = scmp.lt.s32.totalorder %s156_s29, %s156_s29 }
  0x1f   : > { %p1060_p7 = scmp.ne.s32.totalorder %s156_s29, %s1059_s12  ;;  %p1068_p6 = scmp.lt.s32.totalorder %s1059_s12, %s1059_s12 }
  0x21   : > { %p1062_p8 = pnand %p1060_p7, %p1048_p0  ;;  %p1069_p5 = por %p1068_p6, %p1067_p9 }
  0x23   : > { %p1063_p11 = pneg %p1062_p8 }
  0x25   : > { %p1070_p10 = pnand %p1069_p5, %p1063_p11 }
  0x27   : > { %1073 = shalt.err (!%p1070_p10)
}
  0x28   : > { %s1143_s13 = smov 128   ;;  %s1144_s14 = smov 8  }
  0x29   : > { %998 = dma.hbm_to_vmem [thread:$0]  (!%p1232_p12), %s1356_s1, 512, %s156_s29, [#allocation3], %s1143_s13, %s1143_s13, %s1144_s14  }
  0x2a   : > { %p1367_p13 = scmp.ne.s32.totalorder %s1365_s27, 0 }
  0x2b   : > { %p1368_p1 = scmp.eq.s32.totalorder (!%p1367_p13), %s1196_s19, 0 }
  0x2c   : > { %188 = sbr.rel (%p1367_p13) target bundleno = 446 (0x1be), region = 36 }
  0x33   : > { %1119 = dma.done.wait (%p1368_p1), [#allocation3], 512   ;;  %p1369_p0 = pmov %p1368_p1 }
  0x34   : > { %p217_p5 = scmp.lt.s32.totalorder %s1196_s19, 1  ;;  %v1145_v0 = vmov 0   ;;  %v1146_v1 = vmov 0.0|0.0   ;;  %v234_v3 = vld [vmem:[#allocation2] sm:$0xff]  ;;  %v235_v4 = vld [vmem:[#allocation2 + $0x8] sm:$0xff]  ;;  %v236_v5 = vld [vmem:[#allocation2 + $0x10] sm:$0xff]  ;;  %v226_v36 = vlaneseq }
  0x35   : > { %1121 = vsyncadd (%p1369_p0), [#allocation3], 4294966784  ;;  %1045 = vset.pattern.permute.xlu0 %v1145_v0  ;;  %959 = vmatprep.subr.bf16.mxu1 %v1146_v1  ;;  %v249_v6 = vand.u32 4294901760, %v234_v3  ;;  %v252_v7 = vand.u32 4294901760, %v235_v4  ;;  %v237_v8 = vld [vmem:[#allocation2 + $0x18] sm:$0xff]  ;;  %v255_v9 = vand.u32 4294901760, %v236_v5 }
  0x36   : > { %s1261_s23 = scalar_select %p217_p5, %s1196_s19, 1  ;;  %953 = vmatprep.subr.bf16.mxu0 %v1146_v1  ;;  %vm1147_vm0 = vmmov 0   ;;  %v1148_v10 = vmov 0.0   ;;  %v258_v11 = vand.u32 4294901760, %v237_v8  ;;  %v227_v37 = vand.u32 127, %v226_v36 }
  0x37   : > { %906 = vmatprep.mubr.msk.f32.mxu1 %vm1147_vm0, %v1148_v10  ;;  %895 = vmatprep.mubr.msk.f32.mxu0 %vm1147_vm0, %v1148_v10  ;;  %v329_v12 = vsub.f32 %v234_v3, %v249_v6  ;;  %v336_v13 = vsub.f32 %v235_v4, %v252_v7  ;;  %v343_v14 = vsub.f32 %v236_v5, %v255_v9  ;;  %vm244_vm1 = vcmask 261120   ;;  %v848_v47 = vld [vmem:[%s1357_s2] ss:$0 sm:$0xff]  ;;  %s214_s7 = sand.u32 1, %s1132_s16   ;;  %v852_v60 = vld [vmem:[%s1357_s2 + $0x1] ss:$0 sm:$0xff] }
  0x38   : > { %s845_s27 = sshll.u32 %s1261_s23, 3  ;;  %v954_v15 = vpack.c.bf16 %v252_v7, %v249_v6  ;;  %v350_v16 = vsub.f32 %v237_v8, %v258_v11  ;;  %v957_v20 = vpack.c.bf16 %v258_v11, %v255_v9  ;;  %s844_s11 = sshll.u32 %s214_s7, 3 }
  0x39   : > { %s220_s30 = scalar_lea.vmem %s1355_s0, %s845_s27  ;;  %v330_v17 = vand.u32 4294901760, %v329_v12  ;;  %v337_v18 = vand.u32 4294901760, %v336_v13  ;;  %v344_v19 = vand.u32 4294901760, %v343_v14  ;;  %v966_v30 = vpack.c.bf16 %v336_v13, %v329_v12  ;;  %s224_s10 = scalar_lea.vmem %s1358_s3, %s845_s27 }
  0x3a   : > { %v225_v2 = vld [vmem:[%s220_s30] sm:$0xff]  ;;  %955 = vmatpush3.bf16.msra.mxu0 %v954_v15  ;;  %v351_v21 = vand.u32 4294901760, %v350_v16  ;;  %v969_v33 = vpack.c.bf16 %v350_v16, %v343_v14  ;;  %s854_s14 = sshll.u32 %s1196_s19, 7  ;;  %s216_s20 = scalar_lea.vmem [#allocation5], %s844_s11 }
  0x3b   : > { %229 = vperm.xlu0 %1045, %v225_v2   ;;  %956 = vmatprep.subr.bf16.mxu0 %v1146_v1  ;;  %v331_v22 = vsub.f32 %v329_v12, %v330_v17  ;;  %v338_v23 = vsub.f32 %v336_v13, %v337_v18  ;;  %v345_v24 = vsub.f32 %v343_v14, %v344_v19  ;;  %v733_v61 = vld [vmem:[%s224_s10] sm:$0xff]  ;;  %s755_s22 = sshll.u32 %s216_s20, 4  ;;  %s1313_s27 = scalar_lea.hbm %s1359_s4, %s854_s14  ;;  %s1315_s22 = int_to_ptr.vmem [resolvable:$true] %s755_s22 }
  0x3c   : > { %v352_v25 = vsub.f32 %v350_v16, %v351_v21  ;;  %v978_v34 = vpack.c.bf16 %v337_v18, %v330_v17  ;;  %v981_v35 = vpack.c.bf16 %v351_v21, %v344_v19  ;;  %v738_v63 = vmul.f32 %v852_v60, %v733_v61  ;;  %s742_s29 = scalar_lea.sflag [#allocation4], %s214_s7  ;;  %s1074_s30 = scalar_lea.vmem %s1315_s22, 128 }
  0x3d   : > { %v332_v26 = vand.u32 4294901760, %v331_v22  ;;  %v339_v27 = vand.u32 4294901760, %v338_v23  ;;  %v346_v28 = vand.u32 4294901760, %v345_v24  ;;  %p1075_p6 = scmp.ne.s32.totalorder %s1315_s22, %s1074_s30  ;;  %p1370_p9 = scmp.ne.s32.totalorder %s1363_s25, 0 }
  0x3e   : > { %958 = vmatpush3.bf16.msra.mxu0 %v957_v20  ;;  %v353_v29 = vand.u32 4294901760, %v352_v25  ;;  %s1149_s19 = smov [#allocation5]  }
  0x3f   : > { %965 = vmatprep.subr.bf16.mxu0 %v1146_v1  ;;  %v960_v31 = vpack.c.bf16 %v339_v27, %v332_v26  ;;  %p1076_p10 = pnand %p1075_p6, %p1370_p9  ;;  %s1078_s5 = sshll.u32 %s1149_s19, 4  ;;  %s1079_s5 = int_to_ptr.vmem [resolvable:$false] %s1078_s5 }
  0x40   : > { %v963_v32 = vpack.c.bf16 %v353_v29, %v346_v28  ;;  %s1080_s6 = scalar_lea.vmem %s1079_s5, 256  ;;  %p1081_p2 = scmp.lt.s32.totalorder %s1315_s22, %s1079_s5 }
  0x41   : > { %961 = vmatpush3.bf16.msra.mxu1 %v960_v31  ;;  %p1077_p12 = pneg %p1076_p10  ;;  %p1082_p3 = scmp.lt.s32.totalorder %s1080_s6, %s1074_s30 }
  0x42   : > { %962 = vmatprep.subr.bf16.mxu1 %v1146_v1 }
  0x43   : > { %p1083_p4 = por %p1082_p3, %p1081_p2 }
  0x45   : > { %964 = vmatpush3.bf16.msra.mxu1 %v963_v32  ;;  %p1084_p7 = pnand %p1083_p4, %p1077_p12 }
  0x46   : > { %971 = vmatprep.subr.bf16.mxu1 %v1146_v1 }
  0xba   : > { %v230_v38 = vpop.permute.xlu0 %229 }
  0xbb   : > { %vm231_vm2 = vcmp.eq.s32.totalorder %v227_v37, %v230_v38 }
  0xbc   : > { %v847_v39 = vsel %vm231_vm2, 1.0, %v1148_v10 }
  0xbd   : > { %v246_v40 = vsel %vm244_vm1, %v847_v39, 0  ;;  %907 = vmatmul.mubr.msk.f32.vlgmr.msra.gmra.mrb[0].mxu1 %vm244_vm1, %v847_v39 }
  0xbe   : > { %v318_v41 = vsub.f32 %v246_v40, %v246_v40  ;;  %973 = vmatpush3.bf16.msra.mxu1 %v954_v15  ;;  %928 = vmatprep.mubr.msk.f32.mxu1 %vm1147_vm0, %v1148_v10 }
  0xbf   : > { %974 = vmatprep.subr.bf16.mxu1 %v1146_v1 }
  0xc0   : > { %v319_v42 = vand.u32 4294901760, %v318_v41 }
  0xc2   : > { %976 = vmatpush3.bf16.msra.mxu1 %v957_v20  ;;  %v320_v43 = vsub.f32 %v318_v41, %v319_v42 }
  0xc3   : > { %983 = vmatprep.subr.bf16.mxu1 %v1146_v1 }
  0xc4   : > { %v321_v44 = vand.u32 4294901760, %v320_v43 }
  0xc5   : > { %929 = vmatmul.mubr.f32.vlgmr.msra.gmra.mrb[2].mxu1 %v319_v42 }
  0xc6   : > { %985 = vmatpush3.bf16.msra.mxu1 %v954_v15  ;;  %896 = vmatmul.mubr.f32.vlgmr.msra.gmra.mrb[0].mxu0 %v321_v44 }
  0xc7   : > { %967 = vmatpush3.bf16.msra.mxu0 %v966_v30  ;;  %986 = vmatprep.subr.bf16.mxu1 %v1146_v1 }
  0xc8   : > { %968 = vmatprep.subr.bf16.mxu0 %v1146_v1  ;;  %950 = vmatprep.mubr.msk.f32.mxu1 %vm1147_vm0, %v1148_v10 }
  0xc9   : > { %917 = vmatprep.mubr.msk.f32.mxu0 %vm1147_vm0, %v1148_v10 }
  0xca   : > { %988 = vmatpush3.bf16.msra.mxu1 %v957_v20 }
  0xcb   : > { %970 = vmatpush3.bf16.msra.mxu0 %v969_v33 }
  0xcc   : > { %977 = vmatprep.subr.bf16.mxu0 %v1146_v1 }
  0xcd   : > { %951 = vmatmul.mubr.msk.f32.vlgmr.msra.gmra.mrb[4].mxu1 %vm244_vm1, %v847_v39 }
  0xce   : > { %918 = vmatmul.mubr.f32.vlgmr.msra.gmra.mrb[2].mxu0 %v318_v41 }
  0xcf   : > { %979 = vmatpush3.bf16.msra.mxu0 %v978_v34  ;;  %939 = vmatprep.mubr.msk.f32.mxu0 %vm1147_vm0, %v1148_v10 }
  0xd0   : > { %980 = vmatprep.subr.bf16.mxu0 %v1146_v1 }
  0xd3   : > { %982 = vmatpush3.bf16.msra.mxu0 %v981_v35 }
  0xd6   : > { %940 = vmatmul.mubr.msk.f32.vlgmr.msra.gmra.mrb[4].mxu0 %vm244_vm1, %v847_v39 }
 0x190   : > { %v414_v45 = vpop.f32.mrb[0].mxu1 }
 0x191   : > { %v908_v46 = vpop.f32.mrb[1].mxu1 }
 0x198   : > { %v571_v48 = vpop.f32.mrb[2].mxu1 }
 0x199   : > { %v930_v49 = vpop.f32.mrb[3].mxu1  ;;  %v323_v50 = vpop.f32.mrb[0].mxu0 }
 0x19a   : > { %v324_v51 = vadd.f32 %v848_v47, %v323_v50  ;;  %v897_v52 = vpop.f32.mrb[1].mxu0 }
 0x19c   : > { %v415_v53 = vadd.f32 %v414_v45, %v324_v51 }
 0x1a0   : > { %v729_v54 = vpop.f32.mrb[4].mxu1 }
 0x1a1   : > { %v494_v55 = vpop.f32.mrb[2].mxu0  ;;  %v952_v56 = vpop.f32.mrb[5].mxu1 }
 0x1a2   : > { %v495_v57 = vadd.f32 %v494_v55, %v415_v53  ;;  %v919_v58 = vpop.f32.mrb[3].mxu0 }
 0x1a4   : > { %v572_v59 = vadd.f32 %v571_v48, %v495_v57 }
 0x1a9   : > { %v654_v62 = vpop.f32.mrb[4].mxu0 }
 0x1aa   : > { %v655_v0 = vadd.f32 %v654_v62, %v572_v59  ;;  %v941_v1 = vpop.f32.mrb[5].mxu0 }
 0x1ac   : > { %v730_v2 = vadd.f32 %v729_v54, %v655_v0 }
 0x1ae   : > { %v739_v3 = vadd.f32 %v738_v63, %v730_v2 }
 0x1b0   : > { %740 = vst [vmem:[%s216_s20] sm:$0xff] %v739_v3 }
 0x1b1   : > { %1087 = shalt.err (!%p1084_p7)
}
 0x1b2   : > { %s1088_s7 = scalar_lea.hbm %s1313_s27, 128  ;;  %s1092_s10 = scalar_lea.hbm %s1359_s4, 256 }
 0x1b3   : > { %p1089_p8 = scmp.ne.s32.totalorder %s1313_s27, %s1088_s7  ;;  %p1093_p1 = scmp.lt.u32.totalorder %s1313_s27, %s1359_s4 }
 0x1b4   : > { %p1094_p0 = scmp.lt.u32.totalorder %s1092_s10, %s1088_s7  ;;  %p1096_p6 = scmp.lt.u32.totalorder %s1088_s7, %s1313_s27 }
 0x1b5   : > { %p1090_p11 = pnand %p1089_p8, %p1370_p9 }
 0x1b6   : > { %p1095_p5 = por %p1094_p0, %p1093_p1 }
 0x1b7   : > { %p1091_p13 = pneg %p1090_p11 }
 0x1b8   : > { %p1097_p10 = por %p1096_p6, %p1095_p5 }
 0x1ba   : > { %p1098_p12 = pnand %p1097_p10, %p1091_p13 }
 0x1bc   : > { %1101 = shalt.err (!%p1098_p12)
}
 0x1bd   : > { %993 = dma.vmem_to_hbm [thread:$0]  (%p1370_p9), %s1315_s22, 128, %s1313_s27, %s742_s29  }
 0x1be PF: > { %p1005_p2 = scmp.ge.s32.totalorder %s1140_s18, 2  ;;  %s767_s13 = sand.u32 1, %s1128_s15  }
 0x1bf   : > { %p1371_p3 = scmp.ne.s32.totalorder %s1364_s26, 0  ;;  %s768_s14 = scalar_lea.sflag [#allocation4], %s767_s13 }
 0x1c1   : > { %p1000_p4 = pnand %p1005_p2, %p1371_p3 }
 0x1c3   : > { %1123 = dma.done.wait (!%p1000_p4), %s768_s14, 128  }
 0x1c4   : > { %1125 = vsyncadd (!%p1000_p4), %s768_s14, 4294967168  ;;  %p15_p7 = scmp.ge.s32.totalorder %s1200_s21, 4   ;;  %s1372_s15 = smov %s1132_s16 }
 0x1c5   : > { %s1373_s16 = smov %s1136_s17  ;;  %s1374_s17 = smov %s1211_s24 }
 0x1c6   : > { %s1375_s18 = smov %s1200_s21  ;;  %17 = sbr.rel (!%p15_p7) target bundleno = 4 (0x4), region = 79 }
 0x1cd   :  { %773 = vsyncpa [#allocation3], 1 }
 0x1ce   :  { %775 = vsyncpa [#allocation3 + $0x1], 1 }
 0x1cf   :  { %776 = vsyncpa [#allocation4], 1 }
 0x1d0   :  { %778 = vsyncpa [#allocation4 + $0x1], 1 }

</bundles_post_ra>
